<compile_context>
chip_gen: v5e
topology: v5e:2x2
jax: 0.10.0
libtpu: 0.0.40
codegen_flags: <defaults>
</compile_context>

<pallas_src>
import jax
import jax.numpy as jnp
from jax.experimental import pallas as pl
from jax.experimental.pallas import tpu as pltpu

LANES = 128


def _round_up(a: int, b: int) -> int:
    return ((a + b - 1) // b) * b


# ----------------------------------------------------------------------------
# Pallas kernel: one (tile_r, 128) slab of the flattened attn_score
# ----------------------------------------------------------------------------
def _cross_skimmer_kernel(x_ref, w_ref, b_ref, out_ref):
    x = x_ref[...]                     # (tile_r, 128) f32

    w0 = w_ref[0:1, :]                 # (1, 128) lane-broadcast of W[0, 0]
    w1 = w_ref[1:2, :]                 # (1, 128) lane-broadcast of W[1, 0]
    b0 = b_ref[0:1, :]
    b1 = b_ref[1:2, :]

    # Two lane-dense output planes (channel-major): plain VPU fma work,
    # full-width unmasked stores.
    out_ref[0] = x * w0 + b0           # (tile_r, 128)
    out_ref[1] = x * w1 + b1           # (tile_r, 128)


# ----------------------------------------------------------------------------
# Wrapper: flatten -> lane-dense tiles -> kernel -> reshape back to (..., 2)
# ----------------------------------------------------------------------------
def cross_skimmer_pallas(attn_score, weight, bias, *, max_tile_rows=1024):
    """attn_score: any shape; weight: (2, 1) torch Linear weight; bias: (2,)."""
    orig_shape = attn_score.shape
    out_dtype = attn_score.dtype

    x = attn_score.reshape(-1).astype(jnp.float32)
    n = x.shape[0]

    rows = max(1, -(-n // LANES))                       # ceil(n / 128)
    tile_r = min(max_tile_rows, _round_up(rows, 8))     # sublane-aligned tile
    rows_p = _round_up(rows, tile_r)                    # grid-aligned rows
    n_pad = rows_p * LANES

    x = jnp.pad(x, (0, n_pad - n)).reshape(rows_p, LANES)

    # Broadcast the 2 weight scalars / 2 bias scalars to lane-dense planes
    # once, outside the grid.
    w_plane = jnp.broadcast_to(weight.reshape(2, 1).astype(jnp.float32),
                               (2, LANES))
    b_plane = jnp.broadcast_to(bias.reshape(2, 1).astype(jnp.float32),
                               (2, LANES))

    grid = (rows_p // tile_r,)

    out = pl.pallas_call(
        _cross_skimmer_kernel,
        out_shape=jax.ShapeDtypeStruct((2, rows_p, LANES), jnp.float32),
        grid_spec=pltpu.PrefetchScalarGridSpec(
            num_scalar_prefetch=0,
            grid=grid,
            in_specs=[
                pl.BlockSpec((tile_r, LANES), lambda i: (i, 0)),   # x tile
                pl.BlockSpec((2, LANES), lambda i: (0, 0)),        # weight (grid-invariant)
                pl.BlockSpec((2, LANES), lambda i: (0, 0)),        # bias   (grid-invariant)
            ],
            out_specs=pl.BlockSpec((2, tile_r, LANES), lambda i: (0, i, 0)),
        ),
        compiler_params=pltpu.CompilerParams(
            dimension_semantics=("parallel",)),
    )(x, w_plane, b_plane)

    # (2, rows_p, 128) -> (2, N) -> (N, 2) -> orig_shape + (2,)
    out = out.reshape(2, n_pad)[:, :n]
    out = jnp.moveaxis(out, 0, -1)
    return out.reshape(orig_shape + (2,)).astype(out_dtype)


# ----------------------------------------------------------------------------
# Pure-JAX reference (mirrors the PyTorch forward)
# ----------------------------------------------------------------------------
def cross_skimmer_ref(attn_score, weight, bias):
    # Linear(1, 2): y[..., j] = x * W[j, 0] + b[j]
    return attn_score[..., None] * weight[:, 0] + bias


# ----------------------------------------------------------------------------
# Main
# ----------------------------------------------------------------------------
if __name__ == "__main__":
    # attn_score as produced by a cross-attention block: (batch, heads, q, k)
    B, H, Q, K = 2, 4, 8, 8

    key = jax.random.PRNGKey(0)
    k_x, k_w, k_b0, k_b1 = jax.random.split(key, 4)

    attn_score = jax.random.normal(k_x, (B, H, Q, K), dtype=jnp.float32)

    # init_skim_predictor: weight ~ N(0, 0.02); bias[0] ~ N(-5, .02); bias[1] ~ N(+5, .02)
    mean_bias = 5.0
    weight = (0.02 * jax.random.normal(k_w, (2, 1))).astype(jnp.float32)    # (out=2, in=1)
    bias = jnp.stack([
        -mean_bias + 0.02 * jax.random.normal(k_b0, (), dtype=jnp.float32),
        mean_bias + 0.02 * jax.random.normal(k_b1, (), dtype=jnp.float32),
    ]).astype(jnp.float32)                                                   # (2,)

    out = cross_skimmer_pallas(attn_score, weight, bias)
    out = jax.block_until_ready(out)

    ref = cross_skimmer_ref(attn_score, weight, bias)
    assert out.shape == (B, H, Q, K, 2), f"bad shape {out.shape}"
    assert jnp.allclose(out, ref, atol=1e-5, rtol=1e-5), "mismatch vs reference"

    print("KERNEL_OK")
</pallas_src>

<mosaic_0001>
module attributes {stable_mosaic.version = 11 : i64} {
  func.func @_cross_skimmer_kernel(%arg0: i32, %arg1: memref<8x128xf32, #tpu.memory_space<vmem>>, %arg2: memref<2x128xf32, #tpu.memory_space<vmem>>, %arg3: memref<2x128xf32, #tpu.memory_space<vmem>>, %arg4: memref<2x8x128xf32, #tpu.memory_space<vmem>>) attributes {dimension_semantics = [#tpu.dimension_semantics<parallel>], iteration_bounds = array<i64: 1>, scalar_prefetch = 0 : i64, scratch_operands = 0 : i64, tpu.core_type = #tpu.core_type<tc>, window_params = [{transform_indices = @transform_0, window_bounds = array<i64: 8, 128>}, {pipeline_mode = #tpu.pipeline_mode<synchronous>, transform_indices = @transform_1, window_bounds = array<i64: 2, 128>}, {pipeline_mode = #tpu.pipeline_mode<synchronous>, transform_indices = @transform_2, window_bounds = array<i64: 2, 128>}, {transform_indices = @transform_3, window_bounds = array<i64: 2, 8, 128>}]} {
    %c0 = arith.constant 0 : index
    %c0_0 = arith.constant 0 : index
    %0 = vector.load %arg1[%c0, %c0_0] : memref<8x128xf32, #tpu.memory_space<vmem>>, vector<8x128xf32>
    %c0_1 = arith.constant 0 : index
    %c0_2 = arith.constant 0 : index
    %1 = vector.load %arg2[%c0_1, %c0_2] : memref<2x128xf32, #tpu.memory_space<vmem>>, vector<1x128xf32>
    %c1 = arith.constant 1 : index
    %c0_3 = arith.constant 0 : index
    %2 = vector.load %arg2[%c1, %c0_3] : memref<2x128xf32, #tpu.memory_space<vmem>>, vector<1x128xf32>
    %c0_4 = arith.constant 0 : index
    %c0_5 = arith.constant 0 : index
    %3 = vector.load %arg3[%c0_4, %c0_5] : memref<2x128xf32, #tpu.memory_space<vmem>>, vector<1x128xf32>
    %c1_6 = arith.constant 1 : index
    %c0_7 = arith.constant 0 : index
    %4 = vector.load %arg3[%c1_6, %c0_7] : memref<2x128xf32, #tpu.memory_space<vmem>>, vector<1x128xf32>
    %5 = vector.broadcast %1 : vector<1x128xf32> to vector<8x128xf32>
    %6 = arith.mulf %0, %5 : vector<8x128xf32>
    %7 = vector.broadcast %3 : vector<1x128xf32> to vector<8x128xf32>
    %8 = arith.addf %6, %7 : vector<8x128xf32>
    %c0_8 = arith.constant 0 : index
    %c0_9 = arith.constant 0 : index
    %c0_10 = arith.constant 0 : index
    %9 = vector.load %arg4[%c0_8, %c0_9, %c0_10] : memref<2x8x128xf32, #tpu.memory_space<vmem>>, vector<1x8x128xf32>
    %10 = vector.shape_cast %9 : vector<1x8x128xf32> to vector<8x128xf32>
    %11 = vector.shape_cast %8 : vector<8x128xf32> to vector<1x8x128xf32>
    tpu.vector_store %arg4[%c0_8, %c0_9, %c0_10], %11 {strides = array<i32>} : memref<2x8x128xf32, #tpu.memory_space<vmem>>, vector<1x8x128xf32>,
    %12 = vector.broadcast %2 : vector<1x128xf32> to vector<8x128xf32>
    %13 = arith.mulf %0, %12 : vector<8x128xf32>
    %14 = vector.broadcast %4 : vector<1x128xf32> to vector<8x128xf32>
    %15 = arith.addf %13, %14 : vector<8x128xf32>
    %c1_11 = arith.constant 1 : index
    %c0_12 = arith.constant 0 : index
    %c0_13 = arith.constant 0 : index
    %16 = vector.load %arg4[%c1_11, %c0_12, %c0_13] : memref<2x8x128xf32, #tpu.memory_space<vmem>>, vector<1x8x128xf32>
    %17 = vector.shape_cast %16 : vector<1x8x128xf32> to vector<8x128xf32>
    %18 = vector.shape_cast %15 : vector<8x128xf32> to vector<1x8x128xf32>
    tpu.vector_store %arg4[%c1_11, %c0_12, %c0_13], %18 {strides = array<i32>} : memref<2x8x128xf32, #tpu.memory_space<vmem>>, vector<1x8x128xf32>,
    return
  }
  func.func @transform_0(%arg0: i32) -> (i32, i32) {
    %c0_i32 = arith.constant 0 : i32
    %c0_i32_0 = arith.constant 0 : i32
    return %arg0, %c0_i32 : i32, i32
  }
  func.func @transform_1(%arg0: i32) -> (i32, i32) {
    %c0_i32 = arith.constant 0 : i32
    %c0_i32_0 = arith.constant 0 : i32
    %c0_i32_1 = arith.constant 0 : i32
    return %c0_i32, %c0_i32_0 : i32, i32
  }
  func.func @transform_2(%arg0: i32) -> (i32, i32) {
    %c0_i32 = arith.constant 0 : i32
    %c0_i32_0 = arith.constant 0 : i32
    %c0_i32_1 = arith.constant 0 : i32
    return %c0_i32, %c0_i32_0 : i32, i32
  }
  func.func @transform_3(%arg0: i32) -> (i32, i32, i32) {
    %c0_i32 = arith.constant 0 : i32
    %c0_i32_0 = arith.constant 0 : i32
    %c0_i32_1 = arith.constant 0 : i32
    return %c0_i32, %arg0, %c0_i32_0 : i32, i32, i32
  }
}

</mosaic_0001>

<bundles_post_ra>
// kernel: tpu_custom_call.1
= control target key start
LH: loop header
LB: loop body
LE: loop exit
PB: predicated region body
PF: predicated region fallthrough
CT: control target
= control target key end

     0   :  { %8 = vsyncpa [#allocation3], 0  ;;  %s242_s0 = inlined_call_operand.hbm [shape: f32[8,128], index: 0, kind: input, shape index: {}]   ;;  %s243_s1 = inlined_call_operand.hbm [shape: f32[2,128], index: 1, kind: input, shape index: {}]   ;;  %s244_s2 = inlined_call_operand.hbm [shape: f32[2,128], index: 2, kind: input, shape index: {}]   ;;  %s245_s3 = inlined_call_operand.hbm [shape: f32[2,8,128], index: 3, kind: output, shape index: {}]  }
   0x1   :  { %9 = vsyncpa [#allocation6], 0  ;;  %s27_s14 = sshll.u32 %s243_s1, 4  ;;  %s28_s14 = int_to_ptr.hbm [resolvable:$true] %s27_s14 }
   0x2   :  { %10 = vsyncpa [#allocation4], 0  ;;  %s204_s15 = smov [#allocation5]   ;;  %s16_s19 = sshll.u32 %s242_s0, 4  ;;  %s17_s19 = int_to_ptr.hbm [resolvable:$true] %s16_s19 }
   0x3   :  { %s29_s16 = sshll.u32 %s204_s15, 4  ;;  %s205_s20 = smov [#allocation2]   ;;  %s30_s16 = int_to_ptr.vmem [resolvable:$true] %s29_s16 }
   0x4   :  { %32 = dma.hbm_to_vmem [thread:$0]  %s28_s14, 32, %s30_s16, [#allocation6]  }
   0x5   :  { %s18_s21 = sshll.u32 %s205_s20, 4  ;;  %s38_s24 = sshll.u32 %s244_s2, 4  ;;  %s19_s21 = int_to_ptr.vmem [resolvable:$true] %s18_s21  ;;  %s39_s24 = int_to_ptr.hbm [resolvable:$true] %s38_s24 }
   0x6   :  { %21 = dma.hbm_to_vmem [thread:$0]  %s17_s19, 128, %s19_s21, [#allocation3]  }
   0x7   :  { %s206_s1 = smov [#allocation7]  }
   0x8   :  { %s40_s25 = sshll.u32 %s206_s1, 4  ;;  %s41_s25 = int_to_ptr.vmem [resolvable:$true] %s40_s25 }
   0x9   :  { %43 = dma.hbm_to_vmem [thread:$0]  %s39_s24, 32, %s41_s25, [#allocation6]  }
   0xa   :  { %198 = dma.done.wait [#allocation3], 128  }
   0xb   :  { %199 = vsyncadd [#allocation3], 4294967168 }
   0xc   :  { %200 = dma.done.wait [#allocation6], 64  }
   0xd   :  { %201 = vsyncadd [#allocation6], 4294967232  ;;  %s78_s27 = sshll.u32 %s245_s3, 4  ;;  %v56_v0 = vld [vmem:[#allocation2] sm:$0xff]  ;;  %s207_s28 = smov [#allocation8]   ;;  %s79_s27 = int_to_ptr.hbm [resolvable:$true] %s78_s27 }
   0xe   :  { %s76_s29 = sshll.u32 %s207_s28, 4  ;;  %v98_v1 = vld [vmem:[#allocation5] ss:$0 sm:$0xff]  ;;  %v99_v2 = vld [vmem:[#allocation7] ss:$0 sm:$0xff]  ;;  %s208_s2 = smov 128   ;;  %s77_s29 = int_to_ptr.vmem [resolvable:$true] %s76_s29 }
   0xf   :  { %v100_v3 = vld [vmem:[#allocation5 + $0x1] ss:$0 sm:$0xff]  ;;  %v101_v4 = vld [vmem:[#allocation7 + $0x1] ss:$0 sm:$0xff]  ;;  %v62_v5 = vmul.f32 %v98_v1, %v56_v0  ;;  %s209_s30 = smov 8  }
  0x10   :  { %v67_v6 = vmul.f32 %v100_v3, %v56_v0 }
  0x11   :  { %v64_v7 = vadd.f32 %v99_v2, %v62_v5 }
  0x12   :  { %v69_v8 = vadd.f32 %v101_v4, %v67_v6 }
  0x13   :  { %65 = vst [vmem:[#allocation8] sm:$0xff] %v64_v7 }
  0x14   :  { %71 = vst [vmem:[#allocation8 + $0x8] sm:$0xff] %v69_v8 }
  0x15   :  { %84 = dma.vmem_to_hbm [thread:$0]  %s77_s29, 256, %s79_s27, [#allocation4], %s208_s2, %s208_s2, %s209_s30  }
  0x16   :  { %202 = dma.done.wait [#allocation4], 256  }
  0x17   :  { %203 = vsyncadd [#allocation4], 4294967040 }
  0x18   :  { %89 = vsyncpa [#allocation3], 1 }
  0x19   :  { %90 = vsyncpa [#allocation6], 1 }
  0x1a   :  { %91 = vsyncpa [#allocation4], 1 }

</bundles_post_ra>
